<compile_context>
chip_gen: v6e
topology: v6e:2x2x1
jax: 0.10.0
libtpu: 0.0.40
codegen_flags: <defaults>
</compile_context>

<pallas_src>
import numpy as np
import jax
import jax.numpy as jnp
from jax.experimental import pallas as pl
from jax.experimental.pallas import tpu as pltpu


def _bilinear_matrix(out_size, in_size):
    """1-D interpolation matrix matching F.interpolate(mode='bilinear',
    align_corners=False) along one axis (upsampling, no antialias)."""
    if out_size == in_size:
        return jnp.eye(out_size, dtype=jnp.float32)
    dst = np.arange(out_size, dtype=np.float64)
    src = (dst + 0.5) * (in_size / out_size) - 0.5
    src = np.maximum(src, 0.0)
    lo = np.minimum(np.floor(src).astype(np.int64), in_size - 1)
    hi = np.minimum(lo + 1, in_size - 1)
    frac = src - lo
    m = np.zeros((out_size, in_size), dtype=np.float32)
    m[np.arange(out_size), lo] += (1.0 - frac)
    m[np.arange(out_size), hi] += frac
    return jnp.asarray(m)


def mab_kernel(xs2d_ref, phi_ref, x_ref, ups_ref,
               wth_ref, wpsi_ref, bpsi_ref,
               a1_ref, c1_ref, a2_ref, c2_ref,
               out_ref, att_ref):
    """One (batch, HW-tile) grid step.

    xs2d_ref: (1, 4*Cin, HsWs)  space-to-depth input for theta (2x2 stride-2 conv)
    phi_ref : (1, inter, HsWs)  phi(g) bilinearly upsampled to the theta grid
    x_ref   : (1, Cin, T)       channels-first full-res input tile
    ups_ref : (HsWs, T)         bilinear upsample matrix column-tile (low->full res)
    wth_ref : (inter, 4*Cin)    theta weights flattened over the 2x2 taps
    wpsi_ref: (inter, 1), bpsi_ref: (1, 1)   psi 1x1 conv weight / bias
    a1/c1   : W block  (1x1 conv with folded BN)  -> (Cin, Cin), (Cin, 1)
    a2/c2   : combine_gates (1x1 conv + folded BN, then ReLU)
    out_ref : (1, Cin, T)       combine_gates(W(y)) output tile (lane-dense on HW)
    att_ref : (1, 1, T)         upsampled attention map tile
    """
    # ---- low-res attention logits (recomputed per HW tile; tiny work) -----
    theta = jnp.dot(wth_ref[...], xs2d_ref[0],
                    preferred_element_type=jnp.float32)          # (inter, HsWs)
    f = jnp.maximum(theta + phi_ref[0], 0.0)                     # ReLU
    p = jnp.sum(wpsi_ref[...] * f, axis=0, keepdims=True) + bpsi_ref[...]
    att_s = 1.0 / (1.0 + jnp.exp(-p))                            # sigmoid, (1, HsWs)

    # ---- bilinear upsample of the attention map to this full-res tile -----
    att = jnp.dot(att_s, ups_ref[...],
                  preferred_element_type=jnp.float32)            # (1, T)
    att_ref[0] = att.astype(att_ref.dtype)

    # ---- gating + W (1x1 conv + BN) + combine_gates (1x1 conv + BN + ReLU) -
    y = x_ref[0] * att                                           # (Cin, T)
    t = jnp.dot(a1_ref[...], y, preferred_element_type=jnp.float32) + c1_ref[...]
    o = jnp.dot(a2_ref[...], t, preferred_element_type=jnp.float32) + c2_ref[...]
    out_ref[0] = jnp.maximum(o, 0.0).astype(out_ref.dtype)


def multi_attention_forward(x, g, params, eps=1e-5, hw_tile=128):
    """MultiAttentionBlock.forward(input, gating_signal) -> (combined, attention)."""
    x = x.astype(jnp.float32)
    g = g.astype(jnp.float32)
    B, Cin, H, W = x.shape
    _, Cg, Hg, Wg = g.shape
    inter = params["w_theta"].shape[0]
    Hs, Ws = H // 2, W // 2            # theta: kernel=2, stride=2, padding=0
    HW, HsWs = H * W, Hs * Ws
    T = hw_tile if (HW % hw_tile == 0) else HW

    # ---------------- wrapper glue (layout-only / tiny tensors) -------------
    x_flat = x.reshape(B, Cin, HW)                               # channels-first
    # space-to-depth for the 2x2 stride-2 theta conv: a pure permutation,
    # no byte duplication (unlike im2col).
    xs2d = x.reshape(B, Cin, Hs, 2, Ws, 2).transpose(0, 1, 3, 5, 2, 4)
    xs2d = xs2d.reshape(B, Cin * 4, HsWs)
    w_theta_flat = params["w_theta"].reshape(inter, Cin * 4).astype(jnp.float32)

    # phi(g): 1x1 conv + bilinear upsample to the theta grid (tiny tensor).
    hp = jax.lax.Precision.HIGHEST
    phi_g = (jnp.einsum("oi,bihw->bohw", params["w_phi"][:, :, 0, 0], g,
                        precision=hp)
             + params["b_phi"][None, :, None, None])
    Rh = _bilinear_matrix(Hs, Hg)
    Rw = _bilinear_matrix(Ws, Wg)
    phi_up = jnp.einsum("hi,wj,boij->bohw", Rh, Rw, phi_g, precision=hp)
    phi_up = phi_up.reshape(B, inter, HsWs).astype(jnp.float32)

    # attention-map bilinear upsample (Hs,Ws)->(H,W) as a single (HsWs, HW)
    # matrix applied inside the kernel (so the full-res map never makes an
    # extra HBM round trip before the gating multiply).
    # TODO(synk): at production spatial sizes build this separably (two small
    # matmuls) instead of a Kronecker matrix.
    Uh = _bilinear_matrix(H, Hs)
    Uw = _bilinear_matrix(W, Ws)
    ups_t = jnp.kron(Uh, Uw).T.astype(jnp.float32)               # (HsWs, HW)

    w_psi = params["w_psi"][:, :, 0, 0].reshape(inter, 1).astype(jnp.float32)
    b_psi = params["b_psi"].reshape(1, 1).astype(jnp.float32)

    # fold BatchNorm (inference mode, running stats) into the 1x1 convs.
    s_w = params["gamma_w"] / jnp.sqrt(params["var_w"] + eps)
    a1 = (s_w[:, None] * params["w_w"][:, :, 0, 0]).astype(jnp.float32)
    c1 = (s_w * (params["b_w"] - params["mean_w"]) + params["beta_w"])
    c1 = c1.reshape(Cin, 1).astype(jnp.float32)
    s_c = params["gamma_c"] / jnp.sqrt(params["var_c"] + eps)
    a2 = (s_c[:, None] * params["w_c"][:, :, 0, 0]).astype(jnp.float32)
    c2 = (s_c * (params["b_c"] - params["mean_c"]) + params["beta_c"])
    c2 = c2.reshape(Cin, 1).astype(jnp.float32)

    flops = B * (2 * inter * (4 * Cin) * HsWs    # theta matmul
                 + 2 * inter * HsWs              # psi reduce
                 + 2 * HsWs * HW                 # attention upsample matmul
                 + Cin * HW                      # gating multiply
                 + 2 * (2 * Cin * Cin * HW))     # two folded 1x1 convs
    bytes_accessed = 4 * (xs2d.size + phi_up.size + x_flat.size + ups_t.size
                          + w_theta_flat.size + w_psi.size + 1
                          + 2 * Cin * Cin + 2 * Cin
                          + B * Cin * HW + B * HW)
    cost = pl.CostEstimate(flops=flops, transcendentals=B * HsWs,
                           bytes_accessed=bytes_accessed)

    out_flat, att_flat = pl.pallas_call(
        mab_kernel,
        out_shape=(jax.ShapeDtypeStruct((B, Cin, HW), jnp.float32),
                   jax.ShapeDtypeStruct((B, 1, HW), jnp.float32)),
        grid_spec=pltpu.PrefetchScalarGridSpec(
            num_scalar_prefetch=0,
            grid=(B, HW // T),
            in_specs=[
                pl.BlockSpec((1, Cin * 4, HsWs), lambda b, t: (b, 0, 0)),
                pl.BlockSpec((1, inter, HsWs), lambda b, t: (b, 0, 0)),
                pl.BlockSpec((1, Cin, T), lambda b, t: (b, 0, t)),
                pl.BlockSpec((HsWs, T), lambda b, t: (0, t)),
                pl.BlockSpec((inter, Cin * 4), lambda b, t: (0, 0)),
                pl.BlockSpec((inter, 1), lambda b, t: (0, 0)),
                pl.BlockSpec((1, 1), lambda b, t: (0, 0)),
                pl.BlockSpec((Cin, Cin), lambda b, t: (0, 0)),
                pl.BlockSpec((Cin, 1), lambda b, t: (0, 0)),
                pl.BlockSpec((Cin, Cin), lambda b, t: (0, 0)),
                pl.BlockSpec((Cin, 1), lambda b, t: (0, 0)),
            ],
            out_specs=[
                pl.BlockSpec((1, Cin, T), lambda b, t: (b, 0, t)),
                pl.BlockSpec((1, 1, T), lambda b, t: (b, 0, t)),
            ],
        ),
        compiler_params=pltpu.CompilerParams(
            dimension_semantics=("parallel", "parallel"),
            vmem_limit_bytes=32 * 1024 * 1024),
        cost_estimate=cost,
    )(xs2d, phi_up, x_flat, ups_t, w_theta_flat, w_psi, b_psi, a1, c1, a2, c2)

    out = out_flat.reshape(B, Cin, H, W)
    att = att_flat.reshape(B, 1, H, W)
    return out, att


def _reference(x, g, params, eps=1e-5):
    """Pure-JAX reference of MultiAttentionBlock.forward (inference-mode BN)."""
    x = x.astype(jnp.float32)
    g = g.astype(jnp.float32)
    B, Cin, H, W = x.shape
    hp = jax.lax.Precision.HIGHEST
    theta_x = jax.lax.conv_general_dilated(
        x, params["w_theta"], window_strides=(2, 2), padding="VALID",
        dimension_numbers=("NCHW", "OIHW", "NCHW"), precision=hp)
    Hs, Ws = theta_x.shape[2], theta_x.shape[3]
    phi_g = (jnp.einsum("oi,bihw->bohw", params["w_phi"][:, :, 0, 0], g,
                        precision=hp)
             + params["b_phi"][None, :, None, None])
    Rh = _bilinear_matrix(Hs, g.shape[2])
    Rw = _bilinear_matrix(Ws, g.shape[3])
    phi_up = jnp.einsum("hi,wj,boij->bohw", Rh, Rw, phi_g, precision=hp)
    f = jnp.maximum(theta_x + phi_up, 0.0)
    psi_f = (jnp.einsum("oi,bihw->bohw", params["w_psi"][:, :, 0, 0], f,
                        precision=hp)
             + params["b_psi"][None, :, None, None])
    sig = 1.0 / (1.0 + jnp.exp(-psi_f))
    Uh = _bilinear_matrix(H, Hs)
    Uw = _bilinear_matrix(W, Ws)
    att = jnp.einsum("hi,wj,boij->bohw", Uh, Uw, sig, precision=hp)
    y = att * x

    def conv_bn(v, wk, bk, gk, bek, mk, vk):
        z = (jnp.einsum("oi,bihw->bohw", params[wk][:, :, 0, 0], v, precision=hp)
             + params[bk][None, :, None, None])
        z = ((z - params[mk][None, :, None, None])
             / jnp.sqrt(params[vk][None, :, None, None] + eps)
             * params[gk][None, :, None, None]
             + params[bek][None, :, None, None])
        return z

    w_y = conv_bn(y, "w_w", "b_w", "gamma_w", "beta_w", "mean_w", "var_w")
    out = jnp.maximum(conv_bn(w_y, "w_c", "b_c", "gamma_c", "beta_c",
                              "mean_c", "var_c"), 0.0)
    return out, att


if __name__ == "__main__":
    # small shapes consistent with the module:
    # batch=2, in_size=4, gating_channels=6, inter_channels=2, spatial 16x16,
    # gating signal spatial 4x4, sub_sample_factor=(2,2).
    B, Cin, Cg, inter, H, W = 2, 4, 6, 2, 16, 16
    Hg, Wg = 4, 4
    key = jax.random.PRNGKey(0)
    ks = jax.random.split(key, 19)

    def nrm(k, shape, scale=0.3):
        return scale * jax.random.normal(k, shape, dtype=jnp.float32)

    x = jax.random.normal(ks[0], (B, Cin, H, W), dtype=jnp.float32)
    g = jax.random.normal(ks[1], (B, Cg, Hg, Wg), dtype=jnp.float32)

    params = dict(
        w_theta=nrm(ks[2], (inter, Cin, 2, 2)),          # theta: 2x2 s2 conv, no bias
        w_phi=nrm(ks[3], (inter, Cg, 1, 1)),             # phi: 1x1 conv + bias
        b_phi=nrm(ks[4], (inter,)),
        w_psi=nrm(ks[5], (1, inter, 1, 1)),              # psi: 1x1 conv + bias
        b_psi=nrm(ks[6], (1,)),
        w_w=nrm(ks[7], (Cin, Cin, 1, 1)),                # W: 1x1 conv + BN
        b_w=nrm(ks[8], (Cin,)),
        gamma_w=1.0 + 0.1 * jax.random.normal(ks[9], (Cin,), dtype=jnp.float32),
        beta_w=nrm(ks[10], (Cin,), 0.1),
        mean_w=nrm(ks[11], (Cin,), 0.1),
        var_w=1.0 + 0.1 * jax.random.uniform(ks[12], (Cin,), dtype=jnp.float32),
        w_c=nrm(ks[13], (Cin, Cin, 1, 1)),               # combine_gates: conv+BN+ReLU
        b_c=nrm(ks[14], (Cin,)),
        gamma_c=1.0 + 0.1 * jax.random.normal(ks[15], (Cin,), dtype=jnp.float32),
        beta_c=nrm(ks[16], (Cin,), 0.1),
        mean_c=nrm(ks[17], (Cin,), 0.1),
        var_c=1.0 + 0.1 * jax.random.uniform(ks[18], (Cin,), dtype=jnp.float32),
    )
    # TODO(synk): BatchNorm is evaluated in inference mode with running stats;
    # PyTorch's default training-mode BN would use batch statistics.

    fwd = jax.jit(multi_attention_forward)
    out, att = fwd(x, g, params)
    out = jax.block_until_ready(out)
    att = jax.block_until_ready(att)

    ref_out, ref_att = _reference(x, g, params)
    assert out.shape == (B, Cin, H, W), out.shape
    assert att.shape == (B, 1, H, W), att.shape
    assert jnp.allclose(att, ref_att, atol=1e-3, rtol=1e-3), "attention mismatch"
    assert jnp.allclose(out, ref_out, atol=1e-3, rtol=1e-3), "output mismatch"
    print("KERNEL_OK")
</pallas_src>

<mosaic_0001>
module attributes {stable_mosaic.version = 11 : i64} {
  func.func @mab_kernel(%arg0: i32, %arg1: i32, %arg2: memref<1x16x64xf32, #tpu.memory_space<vmem>>, %arg3: memref<1x2x64xf32, #tpu.memory_space<vmem>>, %arg4: memref<1x4x128xf32, #tpu.memory_space<vmem>>, %arg5: memref<64x128xf32, #tpu.memory_space<vmem>>, %arg6: memref<2x16xf32, #tpu.memory_space<vmem>>, %arg7: memref<2x1xf32, #tpu.memory_space<vmem>>, %arg8: memref<1x1xf32, #tpu.memory_space<vmem>>, %arg9: memref<4x4xf32, #tpu.memory_space<vmem>>, %arg10: memref<4x1xf32, #tpu.memory_space<vmem>>, %arg11: memref<4x4xf32, #tpu.memory_space<vmem>>, %arg12: memref<4x1xf32, #tpu.memory_space<vmem>>, %arg13: memref<1x4x128xf32, #tpu.memory_space<vmem>>, %arg14: memref<1x1x128xf32, #tpu.memory_space<vmem>>) attributes {dimension_semantics = [#tpu.dimension_semantics<parallel>, #tpu.dimension_semantics<parallel>], iteration_bounds = array<i64: 2, 2>, scalar_prefetch = 0 : i64, scratch_operands = 0 : i64, tpu.core_type = #tpu.core_type<tc>, window_params = [{transform_indices = @transform_0, window_bounds = array<i64: 1, 16, 64>}, {transform_indices = @transform_1, window_bounds = array<i64: 1, 2, 64>}, {transform_indices = @transform_2, window_bounds = array<i64: 1, 4, 128>}, {transform_indices = @transform_3, window_bounds = array<i64: 64, 128>}, {pipeline_mode = #tpu.pipeline_mode<synchronous>, transform_indices = @transform_4, window_bounds = array<i64: 2, 16>}, {pipeline_mode = #tpu.pipeline_mode<synchronous>, transform_indices = @transform_5, window_bounds = array<i64: 2, 1>}, {pipeline_mode = #tpu.pipeline_mode<synchronous>, transform_indices = @transform_6, window_bounds = array<i64: 1, 1>}, {pipeline_mode = #tpu.pipeline_mode<synchronous>, transform_indices = @transform_7, window_bounds = array<i64: 4, 4>}, {pipeline_mode = #tpu.pipeline_mode<synchronous>, transform_indices = @transform_8, window_bounds = array<i64: 4, 1>}, {pipeline_mode = #tpu.pipeline_mode<synchronous>, transform_indices = @transform_9, window_bounds = array<i64: 4, 4>}, {pipeline_mode = #tpu.pipeline_mode<synchronous>, transform_indices = @transform_10, window_bounds = array<i64: 4, 1>}, {transform_indices = @transform_11, window_bounds = array<i64: 1, 4, 128>}, {transform_indices = @transform_12, window_bounds = array<i64: 1, 1, 128>}]} {
    %c0 = arith.constant 0 : index
    %c0_0 = arith.constant 0 : index
    %0 = vector.load %arg6[%c0, %c0_0] : memref<2x16xf32, #tpu.memory_space<vmem>>, vector<2x16xf32>
    %c0_1 = arith.constant 0 : index
    %c0_2 = arith.constant 0 : index
    %c0_3 = arith.constant 0 : index
    %1 = vector.load %arg2[%c0_1, %c0_2, %c0_3] : memref<1x16x64xf32, #tpu.memory_space<vmem>>, vector<1x16x64xf32>
    %2 = vector.shape_cast %1 : vector<1x16x64xf32> to vector<16x64xf32>
    %cst = arith.constant dense<0.000000e+00> : vector<2x64xf32>
    %3 = tpu.matmul %0, %2, %cst {dimension_numbers = #tpu.dot_dimension_numbers<[1], [0], [0], [1], [0, 0, 1, 1], [], []>} : vector<2x16xf32>, vector<16x64xf32>, vector<2x64xf32> -> vector<2x64xf32>
    %c0_4 = arith.constant 0 : index
    %c0_5 = arith.constant 0 : index
    %c0_6 = arith.constant 0 : index
    %4 = vector.load %arg3[%c0_4, %c0_5, %c0_6] : memref<1x2x64xf32, #tpu.memory_space<vmem>>, vector<1x2x64xf32>
    %5 = vector.shape_cast %4 : vector<1x2x64xf32> to vector<2x64xf32>
    %6 = arith.addf %3, %5 : vector<2x64xf32>
    %cst_7 = arith.constant 0.000000e+00 : f32
    %7 = vector.broadcast %cst_7 : f32 to vector<2x64xf32>
    %8 = arith.maximumf %6, %7 : vector<2x64xf32>
    %c0_8 = arith.constant 0 : index
    %c0_9 = arith.constant 0 : index
    %9 = vector.load %arg7[%c0_8, %c0_9] : memref<2x1xf32, #tpu.memory_space<vmem>>, vector<2x1xf32>
    %10 = vector.broadcast %9 : vector<2x1xf32> to vector<2x64xf32>
    %11 = arith.mulf %10, %8 : vector<2x64xf32>
    %cst_10 = arith.constant dense<0.000000e+00> : vector<64xf32>
    %12 = vector.multi_reduction <add>, %11, %cst_10 [0] : vector<2x64xf32> to vector<64xf32>
    %13 = vector.shape_cast %12 : vector<64xf32> to vector<1x64xf32>
    %c0_11 = arith.constant 0 : index
    %c0_12 = arith.constant 0 : index
    %14 = vector.load %arg8[%c0_11, %c0_12] : memref<1x1xf32, #tpu.memory_space<vmem>>, vector<1x1xf32>
    %15 = vector.broadcast %14 : vector<1x1xf32> to vector<1x64xf32>
    %16 = arith.addf %13, %15 : vector<1x64xf32>
    %cst_13 = arith.constant 0.000000e+00 : f32
    %17 = vector.broadcast %cst_13 : f32 to vector<1x64xf32>
    %18 = arith.subf %17, %16 : vector<1x64xf32>
    %19 = math.exp %18 : vector<1x64xf32>
    %cst_14 = arith.constant 1.000000e+00 : f32
    %20 = vector.broadcast %cst_14 : f32 to vector<1x64xf32>
    %21 = arith.addf %20, %19 : vector<1x64xf32>
    %cst_15 = arith.constant 1.000000e+00 : f32
    %22 = vector.broadcast %cst_15 : f32 to vector<1x64xf32>
    %23 = arith.divf %22, %21 : vector<1x64xf32>
    %c0_16 = arith.constant 0 : index
    %c0_17 = arith.constant 0 : index
    %24 = vector.load %arg5[%c0_16, %c0_17] : memref<64x128xf32, #tpu.memory_space<vmem>>, vector<64x128xf32>
    %cst_18 = arith.constant dense<0.000000e+00> : vector<1x128xf32>
    %25 = tpu.matmul %23, %24, %cst_18 {dimension_numbers = #tpu.dot_dimension_numbers<[1], [0], [0], [1], [0, 0, 1, 1], [], []>} : vector<1x64xf32>, vector<64x128xf32>, vector<1x128xf32> -> vector<1x128xf32>
    %c0_19 = arith.constant 0 : index
    %c0_20 = arith.constant 0 : index
    %c0_21 = arith.constant 0 : index
    %26 = vector.load %arg14[%c0_19, %c0_20, %c0_21] : memref<1x1x128xf32, #tpu.memory_space<vmem>>, vector<1x1x128xf32>
    %27 = vector.shape_cast %26 : vector<1x1x128xf32> to vector<1x128xf32>
    %28 = vector.shape_cast %25 : vector<1x128xf32> to vector<1x1x128xf32>
    tpu.vector_store %arg14[%c0_19, %c0_20, %c0_21], %28 {strides = array<i32>} : memref<1x1x128xf32, #tpu.memory_space<vmem>>, vector<1x1x128xf32>,
    %c0_22 = arith.constant 0 : index
    %c0_23 = arith.constant 0 : index
    %c0_24 = arith.constant 0 : index
    %29 = vector.load %arg4[%c0_22, %c0_23, %c0_24] : memref<1x4x128xf32, #tpu.memory_space<vmem>>, vector<1x4x128xf32>
    %30 = vector.shape_cast %29 : vector<1x4x128xf32> to vector<4x128xf32>
    %31 = vector.broadcast %25 : vector<1x128xf32> to vector<4x128xf32>
    %32 = arith.mulf %30, %31 : vector<4x128xf32>
    %c0_25 = arith.constant 0 : index
    %c0_26 = arith.constant 0 : index
    %33 = vector.load %arg9[%c0_25, %c0_26] : memref<4x4xf32, #tpu.memory_space<vmem>>, vector<4x4xf32>
    %cst_27 = arith.constant dense<0.000000e+00> : vector<4x128xf32>
    %34 = tpu.matmul %33, %32, %cst_27 {dimension_numbers = #tpu.dot_dimension_numbers<[1], [0], [0], [1], [0, 0, 1, 1], [], []>} : vector<4x4xf32>, vector<4x128xf32>, vector<4x128xf32> -> vector<4x128xf32>
    %c0_28 = arith.constant 0 : index
    %c0_29 = arith.constant 0 : index
    %35 = vector.load %arg10[%c0_28, %c0_29] : memref<4x1xf32, #tpu.memory_space<vmem>>, vector<4x1xf32>
    %36 = vector.broadcast %35 : vector<4x1xf32> to vector<4x128xf32>
    %37 = arith.addf %34, %36 : vector<4x128xf32>
    %c0_30 = arith.constant 0 : index
    %c0_31 = arith.constant 0 : index
    %38 = vector.load %arg11[%c0_30, %c0_31] : memref<4x4xf32, #tpu.memory_space<vmem>>, vector<4x4xf32>
    %cst_32 = arith.constant dense<0.000000e+00> : vector<4x128xf32>
    %39 = tpu.matmul %38, %37, %cst_32 {dimension_numbers = #tpu.dot_dimension_numbers<[1], [0], [0], [1], [0, 0, 1, 1], [], []>} : vector<4x4xf32>, vector<4x128xf32>, vector<4x128xf32> -> vector<4x128xf32>
    %c0_33 = arith.constant 0 : index
    %c0_34 = arith.constant 0 : index
    %40 = vector.load %arg12[%c0_33, %c0_34] : memref<4x1xf32, #tpu.memory_space<vmem>>, vector<4x1xf32>
    %41 = vector.broadcast %40 : vector<4x1xf32> to vector<4x128xf32>
    %42 = arith.addf %39, %41 : vector<4x128xf32>
    %cst_35 = arith.constant 0.000000e+00 : f32
    %43 = vector.broadcast %cst_35 : f32 to vector<4x128xf32>
    %44 = arith.maximumf %42, %43 : vector<4x128xf32>
    %c0_36 = arith.constant 0 : index
    %c0_37 = arith.constant 0 : index
    %c0_38 = arith.constant 0 : index
    %45 = vector.load %arg13[%c0_36, %c0_37, %c0_38] : memref<1x4x128xf32, #tpu.memory_space<vmem>>, vector<1x4x128xf32>
    %46 = vector.shape_cast %45 : vector<1x4x128xf32> to vector<4x128xf32>
    %47 = vector.shape_cast %44 : vector<4x128xf32> to vector<1x4x128xf32>
    tpu.vector_store %arg13[%c0_36, %c0_37, %c0_38], %47 {strides = array<i32>} : memref<1x4x128xf32, #tpu.memory_space<vmem>>, vector<1x4x128xf32>,
    return
  }
  func.func @transform_0(%arg0: i32, %arg1: i32) -> (i32, i32, i32) {
    %c0_i32 = arith.constant 0 : i32
    %c0_i32_0 = arith.constant 0 : i32
    %c0_i32_1 = arith.constant 0 : i32
    return %arg0, %c0_i32, %c0_i32_0 : i32, i32, i32
  }
  func.func @transform_1(%arg0: i32, %arg1: i32) -> (i32, i32, i32) {
    %c0_i32 = arith.constant 0 : i32
    %c0_i32_0 = arith.constant 0 : i32
    %c0_i32_1 = arith.constant 0 : i32
    return %arg0, %c0_i32, %c0_i32_0 : i32, i32, i32
  }
  func.func @transform_2(%arg0: i32, %arg1: i32) -> (i32, i32, i32) {
    %c0_i32 = arith.constant 0 : i32
    %c0_i32_0 = arith.constant 0 : i32
    return %arg0, %c0_i32, %arg1 : i32, i32, i32
  }
  func.func @transform_3(%arg0: i32, %arg1: i32) -> (i32, i32) {
    %c0_i32 = arith.constant 0 : i32
    %c0_i32_0 = arith.constant 0 : i32
    return %c0_i32, %arg1 : i32, i32
  }
  func.func @transform_4(%arg0: i32, %arg1: i32) -> (i32, i32) {
    %c0_i32 = arith.constant 0 : i32
    %c0_i32_0 = arith.constant 0 : i32
    %c0_i32_1 = arith.constant 0 : i32
    return %c0_i32, %c0_i32_0 : i32, i32
  }
  func.func @transform_5(%arg0: i32, %arg1: i32) -> (i32, i32) {
    %c0_i32 = arith.constant 0 : i32
    %c0_i32_0 = arith.constant 0 : i32
    %c0_i32_1 = arith.constant 0 : i32
    return %c0_i32, %c0_i32_0 : i32, i32
  }
  func.func @transform_6(%arg0: i32, %arg1: i32) -> (i32, i32) {
    %c0_i32 = arith.constant 0 : i32
    %c0_i32_0 = arith.constant 0 : i32
    %c0_i32_1 = arith.constant 0 : i32
    return %c0_i32, %c0_i32_0 : i32, i32
  }
  func.func @transform_7(%arg0: i32, %arg1: i32) -> (i32, i32) {
    %c0_i32 = arith.constant 0 : i32
    %c0_i32_0 = arith.constant 0 : i32
    %c0_i32_1 = arith.constant 0 : i32
    return %c0_i32, %c0_i32_0 : i32, i32
  }
  func.func @transform_8(%arg0: i32, %arg1: i32) -> (i32, i32) {
    %c0_i32 = arith.constant 0 : i32
    %c0_i32_0 = arith.constant 0 : i32
    %c0_i32_1 = arith.constant 0 : i32
    return %c0_i32, %c0_i32_0 : i32, i32
  }
  func.func @transform_9(%arg0: i32, %arg1: i32) -> (i32, i32) {
    %c0_i32 = arith.constant 0 : i32
    %c0_i32_0 = arith.constant 0 : i32
    %c0_i32_1 = arith.constant 0 : i32
    return %c0_i32, %c0_i32_0 : i32, i32
  }
  func.func @transform_10(%arg0: i32, %arg1: i32) -> (i32, i32) {
    %c0_i32 = arith.constant 0 : i32
    %c0_i32_0 = arith.constant 0 : i32
    %c0_i32_1 = arith.constant 0 : i32
    return %c0_i32, %c0_i32_0 : i32, i32
  }
  func.func @transform_11(%arg0: i32, %arg1: i32) -> (i32, i32, i32) {
    %c0_i32 = arith.constant 0 : i32
    %c0_i32_0 = arith.constant 0 : i32
    return %arg0, %c0_i32, %arg1 : i32, i32, i32
  }
  func.func @transform_12(%arg0: i32, %arg1: i32) -> (i32, i32, i32) {
    %c0_i32 = arith.constant 0 : i32
    %c0_i32_0 = arith.constant 0 : i32
    return %arg0, %c0_i32, %arg1 : i32, i32, i32
  }
}

</mosaic_0001>

<bundles_post_ra>
// kernel: multi_attention_forward.1
= control target key start
LH: loop header
LB: loop body
LE: loop exit
PB: predicated region body
PF: predicated region fallthrough
CT: control target
= control target key end

     0   :  { %s1540_s0 = inlined_call_operand.vmem [shape: f32[2,16,64], index: 0, kind: input, shape index: {}]   ;;  %s1541_s1 = inlined_call_operand.vmem [shape: f32[2,2,64], index: 1, kind: input, shape index: {}]   ;;  %s1542_s2 = inlined_call_operand.vmem [shape: f32[2,4,256], index: 2, kind: input, shape index: {}]   ;;  %s1543_s3 = inlined_call_operand.vmem [shape: f32[64,256], index: 3, kind: input, shape index: {}]   ;;  %s1544_s4 = inlined_call_operand.vmem [shape: f32[2,16], index: 4, kind: input, shape index: {}]   ;;  %s1545_s5 = inlined_call_operand.vmem [shape: f32[2,1], index: 5, kind: input, shape index: {}]   ;;  %s1546_s6 = inlined_call_operand.<no memory space> [shape: f32[1,1], index: 6, kind: input, shape index: {}]   ;;  %s1547_s7 = inlined_call_operand.vmem [shape: f32[4,4], index: 7, kind: input, shape index: {}]   ;;  %s1548_s8 = inlined_call_operand.vmem [shape: f32[4,1], index: 8, kind: input, shape index: {}]   ;;  %s1549_s9 = inlined_call_operand.vmem [shape: f32[4,4], index: 9, kind: input, shape index: {}]   ;;  %s1550_s10 = inlined_call_operand.vmem [shape: f32[4,1], index: 10, kind: input, shape index: {}]   ;;  %s1551_s11 = inlined_call_operand.vmem [shape: f32[2,4,256], index: 11, kind: output, shape index: {0}]   ;;  %s1552_s12 = inlined_call_operand.vmem [shape: f32[2,1,256], index: 12, kind: output, shape index: {1}]  }
   0x1   :  { %1553 = sst [smem:[#allocation4_spill]] %s1540_s0  ;;  %v18_v0 = vstv %s1546_s6 }
   0x2   :  { %1554 = sst [smem:[#allocation5_spill]] %s1541_s1  ;;  %19 = vst [vmem:[#allocation2] sm:$0x1] %v18_v0 }
   0x3   :  { %s1394_s23 = smov 0   ;;  %s1396_s24 = smov 0  }
   0x4   :  { %s1398_s25 = smov 0   ;;  %s1400_s26 = smov 0  }
   0x5   :  { %s1402_s27 = smov 0   ;;  %s1404_s28 = smov 0  }
   0x6   :  { %s1406_s29 = smov 0  }
   0x7 LB: > { %s34_s6 = sadd.s32 1, %s1313_s27  ;;  %s37_s30 = sadd.s32 1, %s1317_s28  ;;  %s1321_s29 = sphi %s1406_s29, %s25_s29   ;;  %s1317_s28 = sphi %s1404_s28, %s1562_s28   ;;  %s1313_s27 = sphi %s1402_s27, %s1561_s27   ;;  %s1309_s26 = sphi %s1400_s26, %s1560_s26   ;;  %s1305_s25 = sphi %s1398_s25, %s1559_s25   ;;  %s1301_s24 = sphi %s1396_s24, %s1558_s24   ;;  %s1297_s23 = sphi %s1394_s23, %s1557_s23  }
   0x8   : > { %p35_p0 = scmp.ge.s32.totalorder %s34_s6, 2  ;;  %s124_s13 = sadd.s32 1, %s1301_s24 }
   0x9   : > { %p131_p1 = scmp.ne.s32.totalorder %s1301_s24, %s1297_s23  ;;  %p132_p2 = scmp.eq.s32.totalorder %s1321_s29, 0 }
   0xa   : > { %s1564_s6 = smov (%p35_p0, %s34_s6), 0  ;;  %s1566_s30 = smov (!%p35_p0, %s37_s30), %s1317_s28 }
   0xb   : > { %s121_s14 = ssub.s32 %s1313_s27, %s1564_s6  ;;  %p133_p3 = por %p132_p2, %p131_p1 }
   0xc   : > { %p39_p4 = scmp.ge.s32.totalorder %s1566_s30, 2  ;;  %p122_p5 = scmp.eq.s32.totalorder %s121_s14, 0 }
   0xd   : > { %p1128_p6 = scmp.ge.s32.totalorder %s1321_s29, 4 }
   0xe   : > { %s1568_s30 = smov (%p39_p4, %s1566_s30), 0 }
   0xf   : > { %s1443_s15 = scalar_select %p122_p5, %s1301_s24, %s124_s13  }
  0x10   : > { %381 = sbr.rel (%p1128_p6) target bundleno = 29 (0x1d), region = 44 }
  0x15   : > { %410 = sbr.rel (!%p133_p3) target bundleno = 29 (0x1d), region = 60  ;;  %s412_s16 = sand.u32 (%p133_p3), 1, %s1301_s24  }
  0x16   : > { %s1130_s17 = sshll.u32 (%p133_p3), %s1313_s27, 3  ;;  %s1129_s18 = sshll.u32 (%p133_p3), %s412_s16, 6 }
  0x17   : > { %s416_s21 = scalar_lea.vmem (%p133_p3), %s1543_s3, %s1130_s17  ;;  %s414_s22 = scalar_lea.vmem (%p133_p3), [#allocation3], %s1129_s18 }
  0x18   : > { %v459_v1 = vld [vmem:[%s416_s21] sm:$0xff] (%p133_p3)  ;;  %v461_v2 = vld [vmem:[%s416_s21 + $0x10] sm:$0xff] (%p133_p3) }
  0x19   : > { %v463_v3 = vld [vmem:[%s416_s21 + $0x20] sm:$0xff] (%p133_p3)  ;;  %460 = vst [vmem:[%s414_s22] sm:$0xff] (%p133_p3), %v459_v1  ;;  %462 = vst [vmem:[%s414_s22 + $0x8] sm:$0xff] (%p133_p3), %v461_v2  ;;  %v465_v4 = vld [vmem:[%s416_s21 + $0x30] sm:$0xff] (%p133_p3) }
  0x1a   : > { %464 = vst [vmem:[%s414_s22 + $0x10] sm:$0xff] %v463_v3  ;;  %v467_v5 = vld [vmem:[%s416_s21 + $0x40] sm:$0xff]  ;;  %v469_v6 = vld [vmem:[%s416_s21 + $0x50] sm:$0xff]  ;;  %466 = vst [vmem:[%s414_s22 + $0x18] sm:$0xff] %v465_v4 }
  0x1b   : > { %468 = vst [vmem:[%s414_s22 + $0x20] sm:$0xff] %v467_v5  ;;  %470 = vst [vmem:[%s414_s22 + $0x28] sm:$0xff] %v469_v6  ;;  %v471_v7 = vld [vmem:[%s416_s21 + $0x60] sm:$0xff]  ;;  %v473_v8 = vld [vmem:[%s416_s21 + $0x70] sm:$0xff] }
  0x1c   : > { %472 = vst [vmem:[%s414_s22 + $0x30] sm:$0xff] %v471_v7  ;;  %474 = vst [vmem:[%s414_s22 + $0x38] sm:$0xff] %v473_v8 }
  0x1d PF: > { %p1131_p7 = scmp.ge.s32.totalorder %s1321_s29, 1  ;;  %p479_p8 = scmp.lt.s32.totalorder %s1321_s29, 5 }
  0x1f   : > { %p480_p9 = pnand %p1131_p7, %p479_p8 }
  0x20   : > { %p554_p10 = scmp.lt.s32.totalorder (!%p480_p9), %s1309_s26, 1  ;;  %s1555_s0 = sld [smem:[#allocation4_spill]] (!%p480_p9) }
  0x21   : > { %483 = sbr.rel (%p480_p9) target bundleno = 885 (0x375), region = 98  ;;  %s486_s22 = sand.u32 (!%p480_p9), 1, %s1297_s23  }
  0x22   : > { %s1132_s13 = sshll.u32 (!%p480_p9), %s486_s22, 6  ;;  %s1556_s1 = sld [smem:[#allocation5_spill]] (!%p480_p9) }
  0x23   : > { %s488_s14 = scalar_lea.vmem (!%p480_p9), [#allocation3], %s1132_s13  ;;  %p565_p11 = scmp.lt.s32.totalorder (!%p480_p9), %s1305_s25, 1 }
  0x26   : > { %v1323_v9 = vmov 0.0   ;;  %vm1324_vm0 = vmmov 0   ;;  %v665_v10 = vld [vmem:[%s1545_s5] sm:$0x3]  ;;  %s1570_s26 = smov (!%p554_p10, %s1309_s26), 1  ;;  %v1325_v11 = vmov 0   ;;  %v686_v31 = vlaneseq }
  0x27   : > { %1166 = vmatprep.subr.mxu0 %v1323_v9  ;;  %1170 = vmatprep.mubr.msk.f32.mxu0 %vm1324_vm0, %v1323_v9  ;;  %s1149_s16 = sshll.u32 %s1570_s26, 4  ;;  %v680_v12 = vld [vmem:[#allocation2] sm:$0x1]  ;;  %vm590_vm1 = vcmask 130048   ;;  %v703_v17 = vld [vmem:[%s488_s14 + $0x30] sm:$0xff]  ;;  %v702_v18 = vld [vmem:[%s488_s14 + $0x28] sm:$0xff] }
  0x28   : > { %1261 = vset.pattern.permute.xlu0 %v1325_v11  ;;  %1173 = vmatprep.subr.mxu1 %v1323_v9  ;;  %s558_s19 = scalar_lea.vmem %s1555_s0, %s1149_s16  ;;  %v586_v15 = vld [vmem:[%s1544_s4] sm:$0x3]  ;;  %v699_v21 = vld [vmem:[%s488_s14 + $0x10] sm:$0xff]  ;;  %v698_v22 = vld [vmem:[%s488_s14 + $0x8] sm:$0xff]  ;;  %s1135_s23 = sshll.u32 %s1570_s26, 1  ;;  %vm672_vm2 = vcmask 517120  }
  0x29   : > { %668 = vperm.xlu0 %1261, %v665_v10   ;;  %1189 = vmatprep.mubr.msk.f32.mxu1 %vm1324_vm0, %v1323_v9  ;;  %v588_v13 = vld [vmem:[%s558_s19 + $0x8] sm:$0xff]  ;;  %v587_v14 = vld [vmem:[%s558_s19] sm:$0xff]  ;;  %s562_s18 = scalar_lea.vmem %s1556_s1, %s1135_s23  ;;  %v687_v35 = vshrl.u32 %v686_v31, 7  ;;  %vm705_vm3 = vcmask 523264   ;;  %s1572_s25 = smov (!%p565_p11, %s1305_s25), 1  ;;  %vm797_vm4 = vcmask 1043456  }
  0x2a   : > { %1262 = vset.pattern.permute.xlu1 %v1325_v11  ;;  %1167 = vmatpush3.msra.mxu0 %v588_v13  ;;  %v704_v16 = vld [vmem:[%s488_s14 + $0x38] sm:$0xff]  ;;  %v701_v19 = vld [vmem:[%s488_s14 + $0x20] sm:$0xff]  ;;  %s568_s13 = sadd.s32 %s1135_s23, %s1572_s25  ;;  %vm793_vm5 = vcmask 31744  }
  0x2b   : > { %1168 = vmatprep.subr.mxu0 %v1323_v9  ;;  %1174 = vmatpush3.msra.mxu1 %v704_v16  ;;  %v700_v20 = vld [vmem:[%s488_s14 + $0x18] sm:$0xff]  ;;  %v697_v23 = vld [vmem:[%s488_s14] sm:$0xff]  ;;  %v688_v37 = vsub.s32 0, %v687_v35  ;;  %s1137_s14 = sshll.u32 %s568_s13, 2  ;;  %s585_s19 = scalar_lea.vmem %s1552_s12, %s568_s13 }
  0x2c   : > { %1169 = vmatpush3.msra.mxu0 %v587_v14  ;;  %1175 = vmatprep.subr.mxu1 %v1323_v9  ;;  %v589_v24 = vld [vmem:[%s562_s18] sm:$0x3]  ;;  %s570_s18 = scalar_lea.vmem %s1542_s2, %s1137_s14  ;;  %s578_s23 = scalar_lea.vmem %s1551_s11, %s1137_s14 }
  0x2d   : > { %683 = vperm.xlu0 %1261, %v680_v12   ;;  %1171 = vmatmul.mubr.msk.f32.vlgmr.msra.gmra.mxu0 %vm590_vm1, %v586_v15  ;;  %v787_v49 = vld [vmem:[%s1548_s8] sm:$0xf] }
  0x2e   : > { %1192 = vmatprep.subr.mxu0 %v1323_v9  ;;  %1194 = vmatprep.mubr.msk.f32.mxu0 %vm1324_vm0, %v1323_v9  ;;  %v872_v50 = vld [vmem:[%s1550_s10] sm:$0xf] }
  0x2f   : > { %1176 = vmatpush3.msra.mxu1 %v703_v17  ;;  %790 = vperm.xlu1 %1262, %v787_v49   ;;  %v780_v52 = vld [vmem:[%s570_s18] sm:$0xf] }
  0x30   : > { %1177 = vmatprep.subr.mxu1 %v1323_v9  ;;  %v786_v56 = vld [vmem:[%s1547_s7] sm:$0xf] }
  0x31   : > { %1178 = vmatpush3.msra.mxu1 %v702_v18  ;;  %v871_v60 = vld [vmem:[%s1549_s9] sm:$0xf] }
  0x32   : > { %1179 = vmatprep.subr.mxu1 %v1323_v9 }
  0x33   : > { %1180 = vmatpush3.msra.mxu1 %v701_v19  ;;  %875 = vperm.xlu1 %1262, %v872_v50  }
  0x34   : > { %1181 = vmatprep.subr.mxu1 %v1323_v9 }
  0x35   : > { %1182 = vmatpush3.msra.mxu1 %v700_v20 }
  0x36   : > { %1183 = vmatprep.subr.mxu1 %v1323_v9 }
  0x37   : > { %1184 = vmatpush3.msra.mxu1 %v699_v21 }
  0x38   : > { %1185 = vmatprep.subr.mxu1 %v1323_v9 }
  0x39   : > { %1186 = vmatpush3.msra.mxu1 %v698_v22 }
  0x3a   : > { %1187 = vmatprep.subr.mxu1 %v1323_v9 }
  0x3b   : > { %1188 = vmatpush3.msra.mxu1 %v697_v23 }
  0xa4   : > { %v669_v29 = vpop.permute.xlu0 %668 }
  0xa8   : > { %v684_v39 = vpop.permute.xlu0 %683 }
  0xa9   : > { %v689_v42 = vrot.slane %v684_v39, %v688_v37 }
  0xaa   : > { %v791_v57 = vpop.permute.xlu1 %790 }
  0xae   : > { %v876_v62 = vpop.permute.xlu1 %875 }
  0xed   : > { %v660_v25 = vpop.f32.mrf.mxu0 }
  0xee   : > { %v661_v26 = vadd.f32 %v660_v25, %v589_v24 }
  0xef   : > { %v1172_v27 = vpop.f32.mrf.mxu0 }
  0xf0   : > { %v664_v28 = vmax.f32 %v661_v26, 0.0 }
  0xf2   : > { %v671_v30 = vmul.f32 %v669_v29, %v664_v28 }
  0xf4   : > { %v673_v32 = vsel %vm672_vm2, %v671_v30, 0.0 }
  0xf5   : > { %v674_v33 = vrot.slane %v673_v32, 4 }
  0xf7   : > { %v675_v34 = vadd.f32 %v674_v33, %v673_v32 }
  0xf9   : > { %v676_v36 = vrot.slane %v675_v34, 2 }
  0xfb   : > { %v677_v38 = vadd.f32 %v676_v36, %v675_v34 }
  0xfd   : > { %v678_v40 = vrot.slane %v677_v38, 1 }
  0xff   : > { %v679_v41 = vadd.f32 %v678_v40, %v677_v38 }
 0x101   : > { %v690_v43 = vadd.f32 %v689_v42, %v679_v41 }
 0x103   : > { %v691_v44 = vsub.f32 0.0, %v690_v43 }
 0x105   : > { %v692_v45 = vmul.f32 1.442695, %v691_v44 }
 0x107   : > { %1263 = vpow2.f32 %v692_v45 }
 0x114   : > { %v1264_v46 = vpop.eup %1263 }
 0x115   : > { %v694_v47 = vadd.f32 1.0, %v1264_v46 }
 0x117   : > { %1265 = vrcp.f32 %v694_v47 }
 0x124   : > { %v1266_v48 = vpop.eup %1265 }
 0x125   : > { %1190 = vmatmul.mubr.msk.f32.vlgmr.msra.gmra.mxu1 %vm705_vm3, %v1266_v48 }
 0x1e5   : > { %v775_v51 = vpop.f32.mrf.mxu1 }
 0x1e6   : > { %779 = vst [vmem:[%s585_s19] sm:$0x1] %v775_v51  ;;  %v784_v53 = vrot.slane %v775_v51, %v688_v37 }
 0x1e7   : > { %v1191_v54 = vpop.f32.mrf.mxu1 }
 0x1e8   : > { %v785_v55 = vmul.f32 %v784_v53, %v780_v52 }
 0x1ea   : > { %1193 = vmatpush3.msk.msra.mxu0 %vm797_vm4, %v785_v55 }
 0x1eb   : > { %1195 = vmatmul.mubr.msk.f32.vlgmr.msra.gmra.mxu0 %vm793_vm5, %v786_v56  ;;  %1197 = vmatprep.subr.mxu0 %v1323_v9 }
 0x1ec   : > { %1199 = vmatprep.mubr.msk.f32.mxu0 %vm1324_vm0, %v1323_v9 }
 0x2ab   : > { %v867_v58 = vpop.f32.mrf.mxu0 }
 0x2ac   : > { %v868_v59 = vadd.f32 %v867_v58, %v791_v57 }
 0x2ad   : > { %v1196_v61 = vpop.f32.mrf.mxu0 }
 0x2ae   : > { %1198 = vmatpush3.msk.msra.mxu0 %vm797_vm4, %v868_v59 }
 0x2af   : > { %1200 = vmatmul.mubr.msk.f32.vlgmr.msra.gmra.mxu0 %vm793_vm5, %v871_v60 }
 0x36f   : > { %v950_v63 = vpop.f32.mrf.mxu0 }
 0x370   : > { %v951_v0 = vadd.f32 %v950_v63, %v876_v62 }
 0x371   : > { %v1201_v1 = vpop.f32.mrf.mxu0 }
 0x372   : > { %v954_v2 = vmax.f32 %v951_v0, 0.0 }
 0x374   : > { %955 = vst [vmem:[%s578_s23] sm:$0xf] %v954_v2 }
 0x375 PF: > { %s25_s29 = sadd.s32 1, %s1321_s29   ;;  %s1557_s23 = smov %s1301_s24 }
 0x376   : > { %p22_p12 = scmp.ge.s32.totalorder %s25_s29, 6   ;;  %s1558_s24 = smov %s1443_s15 }
 0x377   : > { %s1559_s25 = smov %s1313_s27  ;;  %s1560_s26 = smov %s1317_s28 }
 0x378   : > { %s1561_s27 = smov %s1564_s6  ;;  %s1562_s28 = smov %s1568_s30 }
 0x379   :  { %24 = sbr.rel (!%p22_p12) target bundleno = 7 (0x7), region = 158 }

</bundles_post_ra>
